<compile_context>
chip_gen: v5e
topology: v5e:2x2
jax: 0.10.0
libtpu: 0.0.40
codegen_flags: <defaults>
</compile_context>

<pallas_src>
import functools

import numpy as np
import jax
import jax.numpy as jnp
from jax import lax
from jax.experimental import pallas as pl
from jax.experimental.pallas import tpu as pltpu

_LANES = 128      # vreg lane width
_SUBLANES = 8     # vreg sublane count (f32)
_SLAB_ROWS = 64   # in-kernel store slab: 64 x (C*128) f32 = 24 vregs for C=3


def _round_up(x, m):
    return ((x + m - 1) // m) * m


def _num_tensorcores():
    """Best-effort query of TensorCores per chip (v7x = 2). Falls back to 1."""
    try:
        info = pltpu.get_tpu_info()
        for attr in ("num_cores", "tensorcores_per_chip", "cores_per_chip",
                     "num_tensorcores", "core_count"):
            n = getattr(info, attr, None)
            if isinstance(n, int) and n > 0:
                return n
    except Exception:
        pass
    return 1


_NUM_TC = _num_tensorcores()


# ---------------------------------------------------------------------------
# Pallas kernel: fill a (tr, C*128) output block with the constant channel
# pattern.  `pattern_ref` is a (1, C*128) row holding val[c] repeated per lane.
# ---------------------------------------------------------------------------
def _const_fill_kernel(pattern_ref, out_ref, *, slab_rows):
    row = pattern_ref[...]                                   # (1, C*128) f32
    tr, width = out_ref.shape
    if tr <= slab_rows:
        out_ref[...] = jnp.broadcast_to(row, (tr, width))
    else:
        # 64-row slabs keep the broadcast source well inside the 64-vreg file
        # (a whole 2048x384 f32 block would be 768 vregs -> guaranteed spills).
        slab = jnp.broadcast_to(row, (slab_rows, width))     # hoisted out of loop
        n_slabs = tr // slab_rows                            # tr % slab_rows == 0

        def body(k, carry):
            start = pl.multiple_of(k * slab_rows, slab_rows)
            out_ref[pl.ds(start, slab_rows), :] = slab
            return carry

        lax.fori_loop(0, n_slabs, body, 0, unroll=False)


def constant_expand_pallas(value, npix, *, exp_val=True, max_tile_rows=2048,
                           min_pallas_rows=8):
    """Broadcast (exp of) `value` (shape (C,)) to `npix` pixels -> (npix, C) f32."""
    value = jnp.asarray(value, jnp.float32)
    (C,) = value.shape
    # exp hoisted out of the kernel (O(C) work; keeps the kernel a pure fill).
    val = jnp.exp(value) if exp_val else value

    rows = max(1, -(-npix // _LANES))            # ceil(npix / 128) padded rows

    # Tiny outputs: XLA's broadcast is already at roofline, skip the launch.
    # (Kept low by default so small demo shapes still exercise the kernel.)
    if rows < min_pallas_rows:
        return jnp.broadcast_to(val, (npix, C))

    rows8 = _round_up(rows, _SUBLANES)           # pad only to sublane granularity

    # Tile selection: biggest block that fits comfortably.  3 MiB at tr=2048,
    # 6 MiB double-buffered -> safely under v5e's 16 MiB scoped-VMEM default.
    tr = min(max_tile_rows, rows8)
    # Dual-TC chips (v7x): a single-block problem still gets two parallel steps.
    if _NUM_TC >= 2 and -(-rows8 // tr) < 2 and rows8 >= 2 * _SUBLANES:
        tr = _round_up(-(-rows8 // 2), _SUBLANES)
    if tr >= _SLAB_ROWS:
        tr = (tr // _SLAB_ROWS) * _SLAB_ROWS     # slab loop divides tr evenly
    grid = (-(-rows8 // tr),)                    # Pallas clips the final partial block

    width = C * _LANES
    # One-off O(C*128) channel pattern: [v0..v_{C-1}] repeated per lane group.
    pattern = jnp.tile(val, _LANES).reshape(1, width)

    out = pl.pallas_call(
        functools.partial(_const_fill_kernel, slab_rows=_SLAB_ROWS),
        out_shape=jax.ShapeDtypeStruct((rows8, width), jnp.float32),
        grid_spec=pltpu.PrefetchScalarGridSpec(
            num_scalar_prefetch=0,
            grid=grid,
            in_specs=[pl.BlockSpec((1, width), lambda i: (0, 0))],
            out_specs=pl.BlockSpec((tr, width), lambda i: (i, 0)),
        ),
        compiler_params=pltpu.CompilerParams(
            dimension_semantics=("parallel",)),
        cost_estimate=pl.CostEstimate(
            flops=0, transcendentals=0,
            bytes_accessed=rows8 * width * 4 + width * 4),
    )(pattern)

    flat = out.reshape(rows8 * _LANES, C)        # free: identical row-major bytes
    if rows8 * _LANES == npix:
        return flat                              # aligned: no slice copy at all
    # TODO(synk): for unaligned npix inside a fused pipeline, hand the padded
    # (rows8*128, C) slab to the consumer instead of paying this slice copy.
    return flat[:npix]


# ---------------------------------------------------------------------------
# Module ports
# ---------------------------------------------------------------------------
class ConstantJax:
    """JAX port of `Constant`: a C-vector parameter, optionally exp'd, broadcast
    to the shape of `direction`."""

    def __init__(self, value, exp_val=True):
        self.value = jnp.asarray(value, jnp.float32)
        self.exp_val = exp_val

    def forward(self, direction):
        C = self.value.shape[0]
        assert direction.shape[-1] == C, "last dim of direction must equal channels"
        npix = int(np.prod(direction.shape[:-1]))
        flat = constant_expand_pallas(self.value, npix, exp_val=self.exp_val)
        return flat.reshape(direction.shape)

    def reg_loss(self):
        val = jnp.exp(self.value) if self.exp_val else self.value
        return jnp.sum(val)


class GlobalIncidentLightingJax:
    def __init__(self, value=None):
        self.value = value if value is not None else ConstantJax((-2.0, -2.0, -2.0),
                                                                 exp_val=True)

    @property
    def spp(self):
        return 1

    def sample_direction(self, vpos, normal):
        return normal

    def pdf_direction(self, vpos, direction):
        return jnp.ones_like(vpos[:, :, :1, ...])

    def forward(self, direction):
        # torch: self.value(direction.squeeze(0)).unsqueeze(0)
        d = jnp.squeeze(direction, axis=0) if direction.shape[0] == 1 else direction
        return self.value.forward(d)[None]

    # pure-JAX reference for correctness checking
    def forward_ref(self, direction):
        sq_shape = direction.shape[1:] if direction.shape[0] == 1 else direction.shape
        val = jnp.exp(self.value.value) if self.value.exp_val else self.value.value
        return jnp.broadcast_to(val, sq_shape)[None]

    # TODO(synk): pallas_call is not differentiable by default; add a custom_vjp
    # (d out / d value = broadcast-sum) if `value` must be trained through this path.
    def val_reg_loss(self):
        return jnp.zeros_like(self.value.reg_loss())

    def pos_reg_loss(self):
        return jnp.zeros_like(self.value.reg_loss())


# ---------------------------------------------------------------------------
if __name__ == "__main__":
    key = jax.random.PRNGKey(0)
    # direction: (1, batch=2, H=64, W=64, C=3) unit vectors.  The module's
    # forward only consumes the shape; the values never touch the kernel.
    d = jax.random.normal(key, (1, 2, 64, 64, 3), jnp.float32)
    direction = d / jnp.linalg.norm(d, axis=-1, keepdims=True)

    module = GlobalIncidentLightingJax()   # default Constant((-2,-2,-2), exp_val=True)

    out = jax.block_until_ready(module.forward(direction))
    ref = module.forward_ref(direction)
    np.testing.assert_allclose(np.asarray(out), np.asarray(ref),
                               rtol=1e-6, atol=1e-6)
    assert out.shape == direction.shape and out.dtype == jnp.float32

    # Unaligned-npix path: exercises the padded kernel + final slice.
    flat = jax.block_until_ready(
        constant_expand_pallas(module.value.value, 1000, exp_val=True))
    np.testing.assert_allclose(
        np.asarray(flat),
        np.broadcast_to(np.exp(np.asarray(module.value.value)), (1000, 3)),
        rtol=1e-6, atol=1e-6)

    print("KERNEL_OK")
</pallas_src>

<mosaic_0001>
module attributes {stable_mosaic.version = 11 : i64} {
  func.func @_const_fill_kernel(%arg0: i32, %arg1: memref<1x384xf32, #tpu.memory_space<vmem>>, %arg2: memref<64x384xf32, #tpu.memory_space<vmem>>) attributes {dimension_semantics = [#tpu.dimension_semantics<parallel>], iteration_bounds = array<i64: 1>, scalar_prefetch = 0 : i64, scratch_operands = 0 : i64, tpu.core_type = #tpu.core_type<tc>, window_params = [{pipeline_mode = #tpu.pipeline_mode<synchronous>, transform_indices = @transform_0, window_bounds = array<i64: 1, 384>}, {transform_indices = @transform_1, window_bounds = array<i64: 64, 384>}]} {
    %c0 = arith.constant 0 : index
    %c0_0 = arith.constant 0 : index
    %0 = vector.load %arg1[%c0, %c0_0] : memref<1x384xf32, #tpu.memory_space<vmem>>, vector<1x384xf32>
    %1 = vector.shape_cast %0 : vector<1x384xf32> to vector<1x384xf32>
    %2 = vector.broadcast %1 : vector<1x384xf32> to vector<64x384xf32>
    %c0_1 = arith.constant 0 : index
    %c0_2 = arith.constant 0 : index
    %3 = vector.load %arg2[%c0_1, %c0_2] : memref<64x384xf32, #tpu.memory_space<vmem>>, vector<64x384xf32>
    tpu.vector_store %arg2[%c0_1, %c0_2], %2 {strides = array<i32>} : memref<64x384xf32, #tpu.memory_space<vmem>>, vector<64x384xf32>,
    return
  }
  func.func @transform_0(%arg0: i32) -> (i32, i32) {
    %c0_i32 = arith.constant 0 : i32
    %c0_i32_0 = arith.constant 0 : i32
    %c0_i32_1 = arith.constant 0 : i32
    return %c0_i32, %c0_i32_0 : i32, i32
  }
  func.func @transform_1(%arg0: i32) -> (i32, i32) {
    %c0_i32 = arith.constant 0 : i32
    %c0_i32_0 = arith.constant 0 : i32
    return %arg0, %c0_i32 : i32, i32
  }
}

</mosaic_0001>

<bundles_post_ra>
// kernel: tpu_custom_call.1
= control target key start
LH: loop header
LB: loop body
LE: loop exit
PB: predicated region body
PF: predicated region fallthrough
CT: control target
= control target key end

     0   :  { %6 = vsyncpa [#allocation3], 0  ;;  %s150_s0 = inlined_call_operand.hbm [shape: f32[1,384], index: 0, kind: input, shape index: {}]   ;;  %s151_s1 = inlined_call_operand.hbm [shape: f32[64,384], index: 1, kind: output, shape index: {}]  }
   0x1   :  { %7 = vsyncpa [#allocation4], 0  ;;  %s13_s8 = sshll.u32 %s150_s0, 4  ;;  %s130_s9 = smov [#allocation2]   ;;  %s14_s8 = int_to_ptr.hbm [resolvable:$true] %s13_s8 }
   0x2   :  { %s15_s10 = sshll.u32 %s130_s9, 4  ;;  %s16_s10 = int_to_ptr.vmem [resolvable:$true] %s15_s10 }
   0x3   :  { %18 = dma.hbm_to_vmem [thread:$0]  %s14_s8, 48, %s16_s10, [#allocation3]  }
   0x4   :  { %126 = dma.done.wait [#allocation3], 48  }
   0x5   :  { %127 = vsyncadd [#allocation3], 4294967248  ;;  %v23_v0 = vld [vmem:[#allocation2] sm:$0x7]  ;;  %s131_s0 = smov [#allocation5]   ;;  %s61_s14 = sshll.u32 %s151_s1, 4  ;;  %s62_s14 = int_to_ptr.hbm [resolvable:$true] %s61_s14 }
   0x6   :  { %v25_v1 = vperm.slane %v23_v0, 0  ;;  %v26_v2 = vperm.slane %v23_v0, 1  ;;  %v27_v3 = vperm.slane %v23_v0, 2  ;;  %s59_s11 = sshll.u32 %s131_s0, 4  ;;  %s132_s15 = smov 384   ;;  %s60_s11 = int_to_ptr.vmem [resolvable:$true] %s59_s11 }
   0x7   :  { %s133_s16 = smov 24  }
   0x8   :  { %31 = vst [vmem:[#allocation5] sm:$0xff] %v25_v1 }
   0x9   :  { %34 = vst [vmem:[#allocation5 + $0x18] sm:$0xff] %v25_v1 }
   0xa   :  { %37 = vst [vmem:[#allocation5 + $0x30] sm:$0xff] %v25_v1 }
   0xb   :  { %40 = vst [vmem:[#allocation5 + $0x48] sm:$0xff] %v25_v1 }
   0xc   :  { %43 = vst [vmem:[#allocation5 + $0x60] sm:$0xff] %v25_v1 }
   0xd   :  { %46 = vst [vmem:[#allocation5 + $0x78] sm:$0xff] %v25_v1 }
   0xe   :  { %49 = vst [vmem:[#allocation5 + $0x90] sm:$0xff] %v25_v1 }
   0xf   :  { %52 = vst [vmem:[#allocation5 + $0xa8] sm:$0xff] %v25_v1 }
  0x10   :  { %32 = vst [vmem:[#allocation5 + $0x8] sm:$0xff] %v26_v2 }
  0x11   :  { %35 = vst [vmem:[#allocation5 + $0x20] sm:$0xff] %v26_v2 }
  0x12   :  { %38 = vst [vmem:[#allocation5 + $0x38] sm:$0xff] %v26_v2 }
  0x13   :  { %41 = vst [vmem:[#allocation5 + $0x50] sm:$0xff] %v26_v2 }
  0x14   :  { %44 = vst [vmem:[#allocation5 + $0x68] sm:$0xff] %v26_v2 }
  0x15   :  { %47 = vst [vmem:[#allocation5 + $0x80] sm:$0xff] %v26_v2 }
  0x16   :  { %50 = vst [vmem:[#allocation5 + $0x98] sm:$0xff] %v26_v2 }
  0x17   :  { %53 = vst [vmem:[#allocation5 + $0xb0] sm:$0xff] %v26_v2 }
  0x18   :  { %33 = vst [vmem:[#allocation5 + $0x10] sm:$0xff] %v27_v3 }
  0x19   :  { %36 = vst [vmem:[#allocation5 + $0x28] sm:$0xff] %v27_v3 }
  0x1a   :  { %39 = vst [vmem:[#allocation5 + $0x40] sm:$0xff] %v27_v3 }
  0x1b   :  { %42 = vst [vmem:[#allocation5 + $0x58] sm:$0xff] %v27_v3 }
  0x1c   :  { %45 = vst [vmem:[#allocation5 + $0x70] sm:$0xff] %v27_v3 }
  0x1d   :  { %48 = vst [vmem:[#allocation5 + $0x88] sm:$0xff] %v27_v3 }
  0x1e   :  { %51 = vst [vmem:[#allocation5 + $0xa0] sm:$0xff] %v27_v3 }
  0x1f   :  { %54 = vst [vmem:[#allocation5 + $0xb8] sm:$0xff] %v27_v3 }
  0x20   :  { %67 = dma.vmem_to_hbm [thread:$0]  %s60_s11, 3072, %s62_s14, [#allocation4], %s132_s15, %s132_s15, %s133_s16  }
  0x21   :  { %128 = dma.done.wait [#allocation4], 3072  }
  0x22   :  { %129 = vsyncadd [#allocation4], 4294964224 }
  0x23   :  { %72 = vsyncpa [#allocation3], 1 }
  0x24   :  { %73 = vsyncpa [#allocation4], 1 }

</bundles_post_ra>
